<compile_context>
chip_gen: v7x
topology: tpu7x:2x2x1
jax: 0.10.0
libtpu: 0.0.40
codegen_flags: <defaults>
</compile_context>

<pallas_src>
import functools

import jax
import jax.numpy as jnp
from jax import lax
from jax.experimental import pallas as pl
from jax.experimental.pallas import tpu as pltpu


def _round_up(x, n):
    return ((x + n - 1) // n) * n


def _vmem_capacity_bytes():
    """Generation-aware VMEM capacity (64 MiB/TC on v7x, 128 MiB on v5e/v6e)."""
    try:
        cap = int(getattr(pltpu.get_tpu_info(), "vmem_capacity_bytes", 0))
        if cap > 0:
            return cap
    except Exception:
        pass
    return 64 * 1024 * 1024  # conservative (v7x per-TensorCore)


# ---------------------------------------------------------------------------
# Kernels
# ---------------------------------------------------------------------------
def _fast_kernel(x_ref, w_ref, o_ref, *, compute_dtype):
    """Whole weight (K, tn) resident; one dot per (m, n) tile, no K loop."""
    x = x_ref[...].astype(compute_dtype)
    o_ref[...] = jnp.dot(
        x, w_ref[...], preferred_element_type=jnp.float32
    ).astype(o_ref.dtype)


def _masked_partial(x_ref, w_ref, *, compute_dtype, k_rem):
    """Compute one (tm, tn) partial product; mask the ragged K tail if any."""
    x = x_ref[...]
    w = w_ref[...]
    if k_rem:  # static: only when K does not divide tk
        tail = pl.program_id(2) == pl.num_programs(2) - 1
        kc = lax.broadcasted_iota(jnp.int32, x.shape, dimension=1)
        x = jnp.where(jnp.logical_and(tail, kc >= k_rem), jnp.zeros_like(x), x)
        kr = lax.broadcasted_iota(jnp.int32, w.shape, dimension=0)
        w = jnp.where(jnp.logical_and(tail, kr >= k_rem), jnp.zeros_like(w), w)
    return jnp.dot(x.astype(compute_dtype), w, preferred_element_type=jnp.float32)


def _tiled_kernel_f32out(x_ref, w_ref, o_ref, *, compute_dtype, k_rem):
    """K-tiled matmul, f32 output: accumulate directly into the resident
    output block (no scratch, no zero-init pass)."""
    k = pl.program_id(2)
    part = _masked_partial(x_ref, w_ref, compute_dtype=compute_dtype, k_rem=k_rem)

    @pl.when(k == 0)
    def _():
        o_ref[...] = part

    @pl.when(k > 0)
    def _():
        o_ref[...] += part


def _tiled_kernel_scratch(x_ref, w_ref, o_ref, acc_ref, *, compute_dtype, k_rem):
    """K-tiled matmul with an f32 VMEM accumulator (non-f32 outputs)."""
    k = pl.program_id(2)
    part = _masked_partial(x_ref, w_ref, compute_dtype=compute_dtype, k_rem=k_rem)

    @pl.when(k == 0)
    def _():
        acc_ref[...] = part

    @pl.when(k > 0)
    def _():
        acc_ref[...] += part

    @pl.when(k == pl.num_programs(2) - 1)
    def _():
        o_ref[...] = acc_ref[...].astype(o_ref.dtype)


# ---------------------------------------------------------------------------
# Wrapper
# ---------------------------------------------------------------------------
def prepare_linear_weight(weight, compute_dtype=jnp.bfloat16):
    """One-time prep of a PyTorch nn.Linear weight (out_dim, in_dim):
    cast to the MXU feed dtype and transpose to (in_dim, out_dim).
    Do this ONCE at model init, not per forward call."""
    return jnp.asarray(weight).astype(compute_dtype).T


def linear_transform(x, weight_t, *, tm=512, tn=512, tk=512,
                     max_resident_weight_bytes=None):
    """Forward of LinearTransform: y = x @ W.T (no bias).

    x:        (..., input_dim), any float dtype (output keeps x.dtype)
    weight_t: (input_dim, output_dim) -- from prepare_linear_weight(W)
    """
    in_dim, out_dim = weight_t.shape
    assert x.shape[-1] == in_dim
    lead = x.shape[:-1]
    m = 1
    for s in lead:
        m *= s
    x2d = x.reshape(m, in_dim)

    out_dtype = x.dtype
    compute_dtype = weight_t.dtype
    x_item = jnp.dtype(x2d.dtype).itemsize
    w_item = jnp.dtype(compute_dtype).itemsize
    out_item = jnp.dtype(out_dtype).itemsize

    cap = _vmem_capacity_bytes()
    vmem_ceiling = (cap * 3) // 4

    # Sublane rounding: bf16 packs 2 rows / sublane, int8 packs 4.
    sub = 16 if w_item == 2 else (32 if w_item == 1 else 8)

    w_bytes = in_dim * out_dim * w_item
    if max_resident_weight_bytes is None:
        max_resident_weight_bytes = cap // 4  # ~16 MiB v7x, ~32 MiB v5e/v6e

    # ---------------- fast path: whole weight resident in VMEM -------------
    if w_bytes <= max_resident_weight_bytes:
        tm_eff = min(_round_up(tm, sub), _round_up(m, sub))
        mt = pl.cdiv(m, tm_eff)
        if mt == 1 and out_dim >= 256:
            # Small-M (decode) shape: split N so both v7x TensorCores work.
            tn_eff = _round_up(-(-out_dim // 2), 128)
        else:
            tn_eff = out_dim
        nt = pl.cdiv(out_dim, tn_eff)

        def fast_bytes(tm_):
            return (2 * tm_ * in_dim * x_item
                    + 2 * in_dim * tn_eff * w_item
                    + 2 * tm_ * tn_eff * out_item)

        while tm_eff > sub and fast_bytes(tm_eff) > vmem_ceiling:
            tm_eff = max(sub, _round_up(tm_eff // 2, sub))
        mt = pl.cdiv(m, tm_eff)

        vmem_limit = int(min(max(2 * fast_bytes(tm_eff), 16 << 20), vmem_ceiling))
        kernel = functools.partial(_fast_kernel, compute_dtype=compute_dtype)

        out2d = pl.pallas_call(
            kernel,
            out_shape=jax.ShapeDtypeStruct((m, out_dim), out_dtype),
            grid_spec=pltpu.PrefetchScalarGridSpec(
                num_scalar_prefetch=0,
                grid=(mt, nt),
                in_specs=[
                    pl.BlockSpec((tm_eff, in_dim), lambda i, j: (i, 0)),
                    pl.BlockSpec((in_dim, tn_eff), lambda i, j: (0, j)),
                ],
                out_specs=pl.BlockSpec((tm_eff, tn_eff), lambda i, j: (i, j)),
            ),
            compiler_params=pltpu.CompilerParams(
                dimension_semantics=("parallel", "parallel"),
                vmem_limit_bytes=vmem_limit,
            ),
        )(x2d, weight_t)
        return out2d.reshape(*lead, out_dim)

    # ---------------- general path: (M, N, K) tiled reduction --------------
    tm_eff = min(_round_up(tm, sub), _round_up(m, sub))
    tn_eff = out_dim if out_dim <= tn else _round_up(tn, 128)
    if in_dim <= tk:
        tk_eff = in_dim
    else:
        tk_eff = _round_up(tk, 128)
        if in_dim % tk_eff:
            # Prefer a 128-multiple K tile that divides K exactly (no masking).
            d = tk_eff
            while d >= 128 and in_dim % d:
                d -= 128
            if d >= 128:
                tk_eff = d
    k_rem = in_dim % tk_eff

    out_is_f32 = jnp.dtype(out_dtype) == jnp.float32

    def tiled_bytes(tm_):
        b = (2 * tm_ * tk_eff * x_item
             + 2 * tk_eff * tn_eff * w_item
             + 2 * tm_ * tn_eff * out_item)
        if not out_is_f32:
            b += tm_ * tn_eff * 4
        return b

    while tm_eff > sub and tiled_bytes(tm_eff) > vmem_ceiling:
        tm_eff = max(sub, _round_up(tm_eff // 2, sub))

    grid = (pl.cdiv(m, tm_eff), pl.cdiv(out_dim, tn_eff), pl.cdiv(in_dim, tk_eff))
    vmem_limit = int(min(max(2 * tiled_bytes(tm_eff), 16 << 20), vmem_ceiling))

    if out_is_f32:
        kernel = functools.partial(
            _tiled_kernel_f32out, compute_dtype=compute_dtype, k_rem=k_rem)
        scratch = []
    else:
        kernel = functools.partial(
            _tiled_kernel_scratch, compute_dtype=compute_dtype, k_rem=k_rem)
        scratch = [pltpu.VMEM((tm_eff, tn_eff), jnp.float32)]

    out2d = pl.pallas_call(
        kernel,
        out_shape=jax.ShapeDtypeStruct((m, out_dim), out_dtype),
        grid_spec=pltpu.PrefetchScalarGridSpec(
            num_scalar_prefetch=0,
            grid=grid,
            in_specs=[
                pl.BlockSpec((tm_eff, tk_eff), lambda i, j, k: (i, k)),
                pl.BlockSpec((tk_eff, tn_eff), lambda i, j, k: (k, j)),
            ],
            out_specs=pl.BlockSpec((tm_eff, tn_eff), lambda i, j, k: (i, j)),
            scratch_shapes=scratch,
        ),
        compiler_params=pltpu.CompilerParams(
            dimension_semantics=("parallel", "parallel", "arbitrary"),
            vmem_limit_bytes=vmem_limit,
        ),
    )(x2d, weight_t)
    return out2d.reshape(*lead, out_dim)


# ---------------------------------------------------------------------------
# Demo / correctness checks
# ---------------------------------------------------------------------------
if __name__ == "__main__":
    # Shapes consistent with the module's forward:
    # batch=2, seq=8, input_dim=32, output_dim=32.
    batch, seq, input_dim, output_dim = 2, 8, 32, 32

    key = jax.random.PRNGKey(0)
    kx, kw = jax.random.split(key)
    x = jax.random.normal(kx, (batch, seq, input_dim), dtype=jnp.float32)
    # PyTorch nn.Linear layout: (out_dim, in_dim).
    weight = jax.random.normal(kw, (output_dim, input_dim), dtype=jnp.float32) * 0.1

    y_ref = jnp.einsum("btd,od->bto", x, weight)

    # Default path: bf16 MXU feed (f32 accumulation), whole weight resident.
    w_bf16 = prepare_linear_weight(weight, jnp.bfloat16)
    y = jax.block_until_ready(linear_transform(x, w_bf16))
    assert y.shape == (batch, seq, output_dim)
    assert y.dtype == x.dtype
    assert jnp.allclose(y, y_ref, atol=5e-2, rtol=5e-2)

    # f32-fed path: matches the plain JAX reference tightly.
    w_f32 = prepare_linear_weight(weight, jnp.float32)
    y32 = jax.block_until_ready(linear_transform(x, w_f32))
    assert jnp.allclose(y32, y_ref, atol=1e-5, rtol=1e-5)

    # Force the general K-tiled path (incl. ragged-K masking, f32 in-place
    # output accumulation) on a small synthetic problem.
    m2, k2, n2 = 64, 320, 256
    x2 = jax.random.normal(kx, (m2, k2), dtype=jnp.float32)
    w2 = jax.random.normal(kw, (n2, k2), dtype=jnp.float32) * 0.05
    w2t = prepare_linear_weight(w2, jnp.float32)
    y2 = jax.block_until_ready(
        linear_transform(x2, w2t, tm=64, tn=128, tk=128,
                         max_resident_weight_bytes=0))
    y2_ref = x2 @ w2.T
    assert jnp.allclose(y2, y2_ref, atol=1e-4, rtol=1e-4)

    # Same, with bf16 activations/output (exercises the scratch-accumulator
    # variant of the tiled kernel).
    x2b = x2.astype(jnp.bfloat16)
    w2tb = prepare_linear_weight(w2, jnp.bfloat16)
    y2b = jax.block_until_ready(
        linear_transform(x2b, w2tb, tm=64, tn=128, tk=128,
                         max_resident_weight_bytes=0))
    assert y2b.dtype == jnp.bfloat16
    assert jnp.allclose(y2b.astype(jnp.float32), y2_ref, atol=1e-1, rtol=1e-1)

    # TODO(synk): QuantStub/DeQuantStub are identities in float mode; the
    # int8-quantized inference path is not implemented here.
    print("KERNEL_OK")
</pallas_src>

<mosaic_0001>
module attributes {stable_mosaic.version = 11 : i64} {
  func.func @_fast_kernel(%arg0: i32, %arg1: i32, %arg2: memref<16x32xf32, #tpu.memory_space<vmem>>, %arg3: memref<32x32xbf16, #tpu.memory_space<vmem>>, %arg4: memref<16x32xf32, #tpu.memory_space<vmem>>) attributes {dimension_semantics = [#tpu.dimension_semantics<parallel>, #tpu.dimension_semantics<parallel>], iteration_bounds = array<i64: 1, 1>, scalar_prefetch = 0 : i64, scratch_operands = 0 : i64, tpu.core_type = #tpu.core_type<tc>, window_params = [{transform_indices = @transform_0, window_bounds = array<i64: 16, 32>}, {transform_indices = @transform_1, window_bounds = array<i64: 32, 32>}, {transform_indices = @transform_2, window_bounds = array<i64: 16, 32>}]} {
    %c0 = arith.constant 0 : index
    %c0_0 = arith.constant 0 : index
    %0 = vector.load %arg2[%c0, %c0_0] : memref<16x32xf32, #tpu.memory_space<vmem>>, vector<16x32xf32>
    %1 = arith.truncf %0 : vector<16x32xf32> to vector<16x32xbf16>
    %c0_1 = arith.constant 0 : index
    %c0_2 = arith.constant 0 : index
    %2 = vector.load %arg3[%c0_1, %c0_2] : memref<32x32xbf16, #tpu.memory_space<vmem>>, vector<32x32xbf16>
    %cst = arith.constant dense<0.000000e+00> : vector<16x32xf32>
    %3 = tpu.matmul %1, %2, %cst {dimension_numbers = #tpu.dot_dimension_numbers<[1], [0], [0], [1], [0, 0, 1, 1], [], []>} : vector<16x32xbf16>, vector<32x32xbf16>, vector<16x32xf32> -> vector<16x32xf32>
    %c0_3 = arith.constant 0 : index
    %c0_4 = arith.constant 0 : index
    %4 = vector.load %arg4[%c0_3, %c0_4] : memref<16x32xf32, #tpu.memory_space<vmem>>, vector<16x32xf32>
    tpu.vector_store %arg4[%c0_3, %c0_4], %3 {strides = array<i32>} : memref<16x32xf32, #tpu.memory_space<vmem>>, vector<16x32xf32>,
    return
  }
  func.func @transform_0(%arg0: i32, %arg1: i32) -> (i32, i32) {
    %c0_i32 = arith.constant 0 : i32
    %c0_i32_0 = arith.constant 0 : i32
    return %arg0, %c0_i32 : i32, i32
  }
  func.func @transform_1(%arg0: i32, %arg1: i32) -> (i32, i32) {
    %c0_i32 = arith.constant 0 : i32
    %c0_i32_0 = arith.constant 0 : i32
    return %c0_i32, %arg1 : i32, i32
  }
  func.func @transform_2(%arg0: i32, %arg1: i32) -> (i32, i32) {
    %c0_i32 = arith.constant 0 : i32
    return %arg0, %arg1 : i32, i32
  }
}

</mosaic_0001>

<bundles_post_ra>
// kernel: tpu_custom_call.1
= control target key start
LH: loop header
LB: loop body
LE: loop exit
PB: predicated region body
PF: predicated region fallthrough
CT: control target
= control target key end

     0   :  { %7 = vsyncpa [#allocation3], 0  ;;  %s288_s0 = inlined_call_operand.hbm [shape: f32[16,32], index: 0, kind: input, shape index: {}]   ;;  %s289_s1 = inlined_call_operand.hbm [shape: bf16[32,32], index: 1, kind: input, shape index: {}]   ;;  %s290_s2 = inlined_call_operand.hbm [shape: f32[16,32], index: 2, kind: output, shape index: {}]  }
   0x1   :  { %8 = vsyncpa [#allocation6], 0 }
   0x2   :  { %9 = vsyncpa [#allocation4], 0  ;;  %s222_s9 = smov [#allocation2]   ;;  %s150_s13 = scalar_lea.hbm %s288_s0, 256 }
   0x3   :  { %s15_s10 = sshll.u32 %s222_s9, 4  ;;  %p151_p0 = scmp.ne.s32.totalorder %s288_s0, %s150_s13  ;;  %s16_s10 = int_to_ptr.vmem [resolvable:$true] %s15_s10 }
   0x4   :  { %p154_p1 = scmp.lt.u32.totalorder %s150_s13, %s288_s0 }
   0x6   :  { %p156_p2 = pnand %p154_p1, %p151_p0 }
   0x8   :  { %159 = shalt.err (!%p156_p2)
}
   0x9   :  { %s160_s18 = scalar_lea.vmem %s16_s10, 256  ;;  %p165_p4 = scmp.lt.s32.totalorder %s16_s10, %s16_s10 }
   0xa   :  { %p161_p3 = scmp.ne.s32.totalorder %s16_s10, %s160_s18  ;;  %p166_p5 = scmp.lt.s32.totalorder %s160_s18, %s160_s18 }
   0xc   :  { %p167_p6 = por %p166_p5, %p165_p4 }
   0xe   :  { %p168_p7 = pnand %p167_p6, %p161_p3 }
  0x10   :  { %171 = shalt.err (!%p168_p7)
}
  0x11   :  { %s223_s19 = smov 128   ;;  %s224_s20 = smov 8  }
  0x12   :  { %21 = dma.hbm_to_vmem [thread:$0]  %s288_s0, 256, %s16_s10, [#allocation3], %s223_s19, %s223_s19, %s224_s20  }
  0x13   :  { %s225_s23 = smov [#allocation5]   ;;  %s172_s27 = scalar_lea.hbm %s289_s1, 256 }
  0x14   :  { %s27_s24 = sshll.u32 %s225_s23, 4  ;;  %p173_p8 = scmp.ne.s32.totalorder %s289_s1, %s172_s27  ;;  %s28_s24 = int_to_ptr.vmem [resolvable:$true] %s27_s24 }
  0x15   :  { %p176_p9 = scmp.lt.u32.totalorder %s172_s27, %s289_s1 }
  0x17   :  { %p178_p10 = pnand %p176_p9, %p173_p8 }
  0x19   :  { %181 = shalt.err (!%p178_p10)
}
  0x1a   :  { %s182_s4 = scalar_lea.vmem %s28_s24, 256  ;;  %p187_p12 = scmp.lt.s32.totalorder %s28_s24, %s28_s24 }
  0x1b   :  { %p183_p11 = scmp.ne.s32.totalorder %s28_s24, %s182_s4  ;;  %p188_p13 = scmp.lt.s32.totalorder %s182_s4, %s182_s4 }
  0x1d   :  { %p189_p0 = por %p188_p13, %p187_p12 }
  0x1f   :  { %p190_p1 = pnand %p189_p0, %p183_p11 }
  0x21   :  { %193 = shalt.err (!%p190_p1)
}
  0x22   :  { %s226_s0 = smov 64   ;;  %s227_s5 = smov 4  }
  0x23   :  { %33 = dma.hbm_to_vmem [thread:$0]  %s289_s1, 256, %s28_s24, [#allocation6], %s226_s0, %s226_s0, %s227_s5  }
  0x24   :  { %216 = dma.done.wait [#allocation3], 256  }
  0x25   :  { %217 = vsyncadd [#allocation3], 4294967040 }
  0x26   :  { %218 = dma.done.wait [#allocation6], 256  }
  0x27   :  { %219 = vsyncadd [#allocation6], 4294967040  ;;  %v228_v0 = vmov 0.0   ;;  %vm229_vm0 = vmmov 0   ;;  %v148_v1 = vld [vmem:[#allocation5] sm:$0xff]   ;;  %v149_v2 = vld [vmem:[#allocation5 + $0x8] sm:$0xff]  }
  0x28   :  { %131 = vmatprep.subr.bf16.mxu0 %v228_v0  ;;  %135 = vmatprep.mubr.msk.bf16.mxu0 %vm229_vm0, %v228_v0  ;;  %v41_v3 = vld [vmem:[#allocation2] sm:$0xff]  ;;  %v42_v4 = vld [vmem:[#allocation2 + $0x8] sm:$0xff]  ;;  %vm60_vm1 = vcmask 261120   ;;  %s230_s8 = smov [#allocation7]  }
  0x29   :  { %132 = vmatpush3.bf16.msra.mxu0 %v148_v1  ;;  %v43_v5 = vpack.c.bf16 %v42_v4, %v41_v3  ;;  %s112_s1 = sshll.u32 %s230_s8, 4  ;;  %s113_s1 = int_to_ptr.vmem [resolvable:$true] %s112_s1 }
  0x2a   :  { %133 = vmatprep.subr.bf16.mxu0 %v228_v0  ;;  %s194_s9 = scalar_lea.vmem %s113_s1, 256  ;;  %p199_p3 = scmp.lt.s32.totalorder %s113_s1, %s113_s1 }
  0x2b   :  { %p195_p2 = scmp.ne.s32.totalorder %s113_s1, %s194_s9  ;;  %p200_p4 = scmp.lt.s32.totalorder %s194_s9, %s194_s9 }
  0x2d   :  { %134 = vmatpush3.bf16.msra.mxu0 %v149_v2  ;;  %p201_p5 = por %p200_p4, %p199_p3 }
  0x2f   :  { %p202_p6 = pnand %p201_p5, %p195_p2 }
  0x30   :  { %136 = vmatmul.mubr.msk.bf16.vlgmr.msra.gmra.mrb[0].mxu0 %vm60_vm1, %v43_v5 }
 0x103   :  { %v98_v6 = vpop.f32.mrb[0].mxu0 }
 0x104   :  { %105 = vst.msk [vmem:[#allocation7] sm:$0xff] %vm60_vm1, %v98_v6  ;;  %v137_v7 = vpop.f32.mrb[1].mxu0 }
 0x105   :  { %v101_v8 = vpop.f32.mrb[2].mxu0 }
 0x106   :  { %106 = vst.msk [vmem:[#allocation7 + $0x8] sm:$0xff] %vm60_vm1, %v101_v8  ;;  %v138_v9 = vpop.f32.mrb[3].mxu0 }
 0x107   :  { %205 = shalt.err (!%p202_p6)
}
 0x108   :  { %s206_s12 = scalar_lea.hbm %s290_s2, 256 }
 0x109   :  { %p207_p7 = scmp.ne.s32.totalorder %s290_s2, %s206_s12  ;;  %p210_p8 = scmp.lt.u32.totalorder %s206_s12, %s290_s2 }
 0x10b   :  { %p212_p9 = pnand %p210_p8, %p207_p7 }
 0x10d   :  { %215 = shalt.err (!%p212_p9)
}
 0x10e   :  { %118 = dma.vmem_to_hbm [thread:$0]  %s113_s1, 256, %s290_s2, [#allocation4], %s223_s19, %s223_s19, %s224_s20  }
 0x10f   :  { %220 = dma.done.wait [#allocation4], 256  }
 0x110   :  { %221 = vsyncadd [#allocation4], 4294967040 }
 0x111   :  { %122 = vsyncpa [#allocation3], 1 }
 0x112   :  { %123 = vsyncpa [#allocation6], 1 }
 0x113   :  { %124 = vsyncpa [#allocation4], 1 }

</bundles_post_ra>
